<compile_context>
chip_gen: v5e
topology: v5e:2x2
jax: 0.10.0
libtpu: 0.0.40
codegen_flags: <defaults>
</compile_context>

<pallas_src>
import functools

import jax
import jax.numpy as jnp
from jax.experimental import pallas as pl
from jax.experimental.pallas import tpu as pltpu


def _round_up(x, m):
    return ((x + m - 1) // m) * m


def _vmem_capacity_bytes():
    """Per-TensorCore VMEM capacity; falls back to the v7x-safe 64 MiB."""
    try:
        return int(pltpu.get_tpu_info().vmem_capacity_bytes)
    except Exception:
        return 64 << 20


def _mlp_kernel(nlayers, *refs):
    """One batch tile of the fused MLP forward.

    refs = (x_ref, w0, b0, w1, b1, ..., w_out, b_out, o_ref)
    MXU matmuls run in bf16 with f32 accumulation; elementwise math stays f32
    (v5e-safe: no bf16 VPU/EUP there).
    """
    x_ref = refs[0]
    o_ref = refs[-1]
    wb = refs[1:-1]

    h = x_ref[...]                                   # bf16 [TB, K_pad]
    # Dropout is identity in eval mode.
    # TODO(synk): training-mode dropout (pltpu.prng_random_bits mask) not implemented.
    for l in range(nlayers):
        w = wb[2 * l][...]                           # bf16 [in_pad, H_pad]
        b = wb[2 * l + 1][...]                       # f32  [1, H_pad]
        a = jnp.dot(h, w, preferred_element_type=jnp.float32) + b
        a = jnp.maximum(a, 0.0)                      # f32 ReLU on the VPU
        h = a.astype(jnp.bfloat16)                   # bf16 for the next MXU pass

    w_out = wb[-2][...]
    b_out = wb[-1][...]
    logits = jnp.dot(h, w_out, preferred_element_type=jnp.float32) + b_out
    # sigmoid: exp on the EUP; exact reciprocal (epilogue is tiny, keeps
    # output probabilities calibrated vs. the ~1e-3 error of approx=True).
    o_ref[...] = pl.reciprocal(1.0 + jnp.exp(-logits), approx=False)


def prepare_params(params):
    """One-time padding / bf16 conversion of the weights (hoisted out of the
    per-call forward path — weights are static for inference).

    params: list of (w, b) with w [in, out] f32 (transpose of nn.Linear.weight),
    b [out] or [1, out] f32. The last (w, b) is the output head (-> sigmoid).
    """
    nlayers = len(params) - 1
    nfeatures = params[0][0].shape[0]
    hidden_size = params[0][0].shape[1]
    ntargets = params[-1][0].shape[1]

    # Lane-dense padding (multiples of 128): kills masked partial stores and
    # MXU lane padding. Zero padding keeps the forward exact.
    K_pad = _round_up(nfeatures, 128)
    H_pad = _round_up(hidden_size, 128)
    N_pad = _round_up(ntargets, 128)

    in_dims = [K_pad] + [H_pad] * nlayers
    out_dims = [H_pad] * nlayers + [N_pad]
    padded = []
    for (w, b), ip, op in zip(params, in_dims, out_dims):
        wi, wo = w.shape
        w_p = jnp.zeros((ip, op), jnp.bfloat16).at[:wi, :wo].set(
            w.astype(jnp.bfloat16))
        b_p = jnp.zeros((1, op), jnp.float32).at[:, :wo].set(
            jnp.reshape(b, (1, -1)).astype(jnp.float32))
        padded.append((jax.block_until_ready(w_p), jax.block_until_ready(b_p)))

    return dict(padded=tuple(padded), nlayers=nlayers, nfeatures=nfeatures,
                hidden_size=hidden_size, ntargets=ntargets,
                K_pad=K_pad, H_pad=H_pad, N_pad=N_pad)


def regularized_regression_forward(x, prepared):
    """x: [batch, nfeatures] f32. prepared: output of prepare_params()."""
    nlayers = prepared["nlayers"]
    nfeatures = prepared["nfeatures"]
    hidden_size = prepared["hidden_size"]
    ntargets = prepared["ntargets"]
    K_pad, H_pad, N_pad = prepared["K_pad"], prepared["H_pad"], prepared["N_pad"]
    padded_wb = prepared["padded"]

    batch = x.shape[0]
    assert x.shape[1] == nfeatures

    # ---- VMEM budget, generation aware --------------------------------------
    capacity = _vmem_capacity_bytes()
    # ~96 MiB usable on v5e/v6e (128 MiB physical), ~48 MiB on v7x (64 MiB).
    usable = min(capacity * 3 // 4, capacity - (16 << 20))

    # Resident weights are single-buffered (constant index_map + Buffered(1)).
    w_bytes = sum(int(w.size) * 2 + int(b.size) * 4 for w, b in padded_wb)
    # TODO(synk): if w_bytes alone overflows `usable` (very large hidden on v7x's
    # 64 MiB VMEM), stream weight tiles over an 'arbitrary' contraction grid axis
    # with a VMEM accumulator instead of keeping every layer resident.

    # Bytes per batch row: double-buffered x/out tiles + live f32/bf16 activations.
    per_row = 2 * K_pad * 2 + 2 * N_pad * 4 + H_pad * 6
    headroom = 4 << 20
    tb_budget = max(8, (usable - w_bytes - headroom) // max(per_row, 1))

    # ---- batch tile: large (amortize ~0.35us/step + DMA setup), balanced ----
    TB_max = int(min(1024, tb_budget, _round_up(batch, 8)))
    TB_max = max(8, (TB_max // 8) * 8)
    ntiles = -(-batch // TB_max)                      # ceil-div
    TB = _round_up(-(-batch // ntiles), 8)            # balanced tile, mult. of 8
    batch_pad = ntiles * TB
    grid = (ntiles,)

    # Zero-padded activations (padded rows/features contribute 0; sliced off below).
    x_p = jnp.zeros((batch_pad, K_pad), jnp.bfloat16).at[:batch, :nfeatures].set(
        x.astype(jnp.bfloat16))

    flat_args = [x_p]
    in_specs = [pl.BlockSpec((TB, K_pad), lambda i: (i, 0))]
    for w_p, b_p in padded_wb:
        flat_args += [w_p, b_p]
        # Constant index_map + single buffer: fetched once, resident across grid.
        in_specs.append(pl.BlockSpec(w_p.shape, lambda i: (0, 0),
                                     pipeline_mode=pl.Buffered(1)))
        in_specs.append(pl.BlockSpec(b_p.shape, lambda i: (0, 0),
                                     pipeline_mode=pl.Buffered(1)))
    out_spec = pl.BlockSpec((TB, N_pad), lambda i: (i, 0))

    # Advisory cost estimate on REAL (unpadded) dims.
    flops = 2 * batch * (nfeatures * hidden_size
                         + (nlayers - 1) * hidden_size * hidden_size
                         + hidden_size * ntargets)
    real_w_bytes = 2 * (nfeatures * hidden_size
                        + (nlayers - 1) * hidden_size * hidden_size
                        + hidden_size * ntargets) \
                   + 4 * (nlayers * hidden_size + ntargets)
    bytes_accessed = batch * nfeatures * 2 + real_w_bytes + batch * ntargets * 4
    cost = pl.CostEstimate(flops=flops, transcendentals=batch * ntargets,
                           bytes_accessed=bytes_accessed)

    # VMEM limit: actual need + headroom, clamped to the generation's budget.
    vmem_needed = (w_bytes                       # single-buffered weights/biases
                   + 2 * TB * K_pad * 2          # double-buffered x tiles (bf16)
                   + 2 * TB * N_pad * 4          # double-buffered out tiles (f32)
                   + TB * H_pad * 6)             # live activations (f32 + bf16)
    vmem_limit = int(min(max(vmem_needed + (8 << 20), 16 << 20), usable))

    kernel = functools.partial(_mlp_kernel, nlayers)

    out_p = pl.pallas_call(
        kernel,
        out_shape=jax.ShapeDtypeStruct((batch_pad, N_pad), jnp.float32),
        grid=grid,
        in_specs=in_specs,
        out_specs=out_spec,
        compiler_params=pltpu.CompilerParams(
            dimension_semantics=("parallel",),    # megacore-shard batch tiles (v7x)
            vmem_limit_bytes=vmem_limit),
        cost_estimate=cost,
    )(*flat_args)

    return out_p[:batch, :ntargets]


def init_params(key, nfeatures, ntargets, nlayers, hidden_size):
    """Deterministic parameter init matching the PyTorch module's layer shapes."""
    params = []
    in_dim = nfeatures
    for _ in range(nlayers):
        key, kw, kb = jax.random.split(key, 3)
        bound = 1.0 / jnp.sqrt(in_dim)
        w = jax.random.uniform(kw, (in_dim, hidden_size), jnp.float32, -bound, bound)
        b = jax.random.uniform(kb, (1, hidden_size), jnp.float32, -bound, bound)
        params.append((w, b))
        in_dim = hidden_size
    key, kw, kb = jax.random.split(key, 3)
    bound = 1.0 / jnp.sqrt(in_dim)
    w = jax.random.uniform(kw, (in_dim, ntargets), jnp.float32, -bound, bound)
    b = jax.random.uniform(kb, (1, ntargets), jnp.float32, -bound, bound)
    params.append((w, b))
    return params


def reference_forward(x, params):
    """Pure-JAX reference mirroring the kernel's bf16-MXU / f32-accumulate numerics."""
    h = x.astype(jnp.bfloat16)
    for w, b in params[:-1]:
        a = jnp.dot(h, w.astype(jnp.bfloat16), preferred_element_type=jnp.float32) + b
        h = jnp.maximum(a, 0.0).astype(jnp.bfloat16)
    w, b = params[-1]
    logits = jnp.dot(h, w.astype(jnp.bfloat16), preferred_element_type=jnp.float32) + b
    return jax.nn.sigmoid(logits)


if __name__ == "__main__":
    # Small, module-consistent shapes.
    batch, nfeatures, ntargets, nlayers, hidden_size = 8, 16, 4, 3, 32

    key = jax.random.PRNGKey(0)
    key, kx = jax.random.split(key)
    x = jax.random.normal(kx, (batch, nfeatures), jnp.float32)
    params = init_params(key, nfeatures, ntargets, nlayers, hidden_size)

    prepared = prepare_params(params)          # one-time weight pad/convert
    out = regularized_regression_forward(x, prepared)
    out = jax.block_until_ready(out)

    ref = reference_forward(x, params)
    assert out.shape == (batch, ntargets)
    # Tolerance accounts for bf16-MXU logits.
    assert jnp.allclose(out, ref, atol=1e-2, rtol=1e-2), "mismatch vs reference"

    print("KERNEL_OK")
</pallas_src>

<mosaic_0001>
module attributes {stable_mosaic.version = 11 : i64} {
  func.func @_mlp_kernel(%arg0: i32, %arg1: memref<8x128xbf16, #tpu.memory_space<vmem>>, %arg2: memref<128x128xbf16, #tpu.memory_space<vmem>>, %arg3: memref<1x128xf32, #tpu.memory_space<vmem>>, %arg4: memref<128x128xbf16, #tpu.memory_space<vmem>>, %arg5: memref<1x128xf32, #tpu.memory_space<vmem>>, %arg6: memref<128x128xbf16, #tpu.memory_space<vmem>>, %arg7: memref<1x128xf32, #tpu.memory_space<vmem>>, %arg8: memref<128x128xbf16, #tpu.memory_space<vmem>>, %arg9: memref<1x128xf32, #tpu.memory_space<vmem>>, %arg10: memref<8x128xf32, #tpu.memory_space<vmem>>) attributes {dimension_semantics = [#tpu.dimension_semantics<parallel>], iteration_bounds = array<i64: 1>, scalar_prefetch = 0 : i64, scratch_operands = 0 : i64, tpu.core_type = #tpu.core_type<tc>, window_params = [{transform_indices = @transform_0, window_bounds = array<i64: 8, 128>}, {pipeline_mode = #tpu.pipeline_mode<synchronous>, transform_indices = @transform_1, window_bounds = array<i64: 128, 128>}, {pipeline_mode = #tpu.pipeline_mode<synchronous>, transform_indices = @transform_2, window_bounds = array<i64: 1, 128>}, {pipeline_mode = #tpu.pipeline_mode<synchronous>, transform_indices = @transform_3, window_bounds = array<i64: 128, 128>}, {pipeline_mode = #tpu.pipeline_mode<synchronous>, transform_indices = @transform_4, window_bounds = array<i64: 1, 128>}, {pipeline_mode = #tpu.pipeline_mode<synchronous>, transform_indices = @transform_5, window_bounds = array<i64: 128, 128>}, {pipeline_mode = #tpu.pipeline_mode<synchronous>, transform_indices = @transform_6, window_bounds = array<i64: 1, 128>}, {pipeline_mode = #tpu.pipeline_mode<synchronous>, transform_indices = @transform_7, window_bounds = array<i64: 128, 128>}, {pipeline_mode = #tpu.pipeline_mode<synchronous>, transform_indices = @transform_8, window_bounds = array<i64: 1, 128>}, {transform_indices = @transform_9, window_bounds = array<i64: 8, 128>}]} {
    %c0 = arith.constant 0 : index
    %c0_0 = arith.constant 0 : index
    %0 = vector.load %arg1[%c0, %c0_0] : memref<8x128xbf16, #tpu.memory_space<vmem>>, vector<8x128xbf16>
    %c0_1 = arith.constant 0 : index
    %c0_2 = arith.constant 0 : index
    %1 = vector.load %arg2[%c0_1, %c0_2] : memref<128x128xbf16, #tpu.memory_space<vmem>>, vector<128x128xbf16>
    %c0_3 = arith.constant 0 : index
    %c0_4 = arith.constant 0 : index
    %2 = vector.load %arg3[%c0_3, %c0_4] : memref<1x128xf32, #tpu.memory_space<vmem>>, vector<1x128xf32>
    %cst = arith.constant dense<0.000000e+00> : vector<8x128xf32>
    %3 = tpu.matmul %0, %1, %cst {dimension_numbers = #tpu.dot_dimension_numbers<[1], [0], [0], [1], [0, 0, 1, 1], [], []>} : vector<8x128xbf16>, vector<128x128xbf16>, vector<8x128xf32> -> vector<8x128xf32>
    %4 = vector.broadcast %2 : vector<1x128xf32> to vector<8x128xf32>
    %5 = arith.addf %3, %4 : vector<8x128xf32>
    %cst_5 = arith.constant 0.000000e+00 : f32
    %6 = vector.broadcast %cst_5 : f32 to vector<8x128xf32>
    %7 = arith.maximumf %5, %6 : vector<8x128xf32>
    %8 = arith.truncf %7 : vector<8x128xf32> to vector<8x128xbf16>
    %c0_6 = arith.constant 0 : index
    %c0_7 = arith.constant 0 : index
    %9 = vector.load %arg4[%c0_6, %c0_7] : memref<128x128xbf16, #tpu.memory_space<vmem>>, vector<128x128xbf16>
    %c0_8 = arith.constant 0 : index
    %c0_9 = arith.constant 0 : index
    %10 = vector.load %arg5[%c0_8, %c0_9] : memref<1x128xf32, #tpu.memory_space<vmem>>, vector<1x128xf32>
    %cst_10 = arith.constant dense<0.000000e+00> : vector<8x128xf32>
    %11 = tpu.matmul %8, %9, %cst_10 {dimension_numbers = #tpu.dot_dimension_numbers<[1], [0], [0], [1], [0, 0, 1, 1], [], []>} : vector<8x128xbf16>, vector<128x128xbf16>, vector<8x128xf32> -> vector<8x128xf32>
    %12 = vector.broadcast %10 : vector<1x128xf32> to vector<8x128xf32>
    %13 = arith.addf %11, %12 : vector<8x128xf32>
    %cst_11 = arith.constant 0.000000e+00 : f32
    %14 = vector.broadcast %cst_11 : f32 to vector<8x128xf32>
    %15 = arith.maximumf %13, %14 : vector<8x128xf32>
    %16 = arith.truncf %15 : vector<8x128xf32> to vector<8x128xbf16>
    %c0_12 = arith.constant 0 : index
    %c0_13 = arith.constant 0 : index
    %17 = vector.load %arg6[%c0_12, %c0_13] : memref<128x128xbf16, #tpu.memory_space<vmem>>, vector<128x128xbf16>
    %c0_14 = arith.constant 0 : index
    %c0_15 = arith.constant 0 : index
    %18 = vector.load %arg7[%c0_14, %c0_15] : memref<1x128xf32, #tpu.memory_space<vmem>>, vector<1x128xf32>
    %cst_16 = arith.constant dense<0.000000e+00> : vector<8x128xf32>
    %19 = tpu.matmul %16, %17, %cst_16 {dimension_numbers = #tpu.dot_dimension_numbers<[1], [0], [0], [1], [0, 0, 1, 1], [], []>} : vector<8x128xbf16>, vector<128x128xbf16>, vector<8x128xf32> -> vector<8x128xf32>
    %20 = vector.broadcast %18 : vector<1x128xf32> to vector<8x128xf32>
    %21 = arith.addf %19, %20 : vector<8x128xf32>
    %cst_17 = arith.constant 0.000000e+00 : f32
    %22 = vector.broadcast %cst_17 : f32 to vector<8x128xf32>
    %23 = arith.maximumf %21, %22 : vector<8x128xf32>
    %24 = arith.truncf %23 : vector<8x128xf32> to vector<8x128xbf16>
    %c0_18 = arith.constant 0 : index
    %c0_19 = arith.constant 0 : index
    %25 = vector.load %arg8[%c0_18, %c0_19] : memref<128x128xbf16, #tpu.memory_space<vmem>>, vector<128x128xbf16>
    %c0_20 = arith.constant 0 : index
    %c0_21 = arith.constant 0 : index
    %26 = vector.load %arg9[%c0_20, %c0_21] : memref<1x128xf32, #tpu.memory_space<vmem>>, vector<1x128xf32>
    %cst_22 = arith.constant dense<0.000000e+00> : vector<8x128xf32>
    %27 = tpu.matmul %24, %25, %cst_22 {dimension_numbers = #tpu.dot_dimension_numbers<[1], [0], [0], [1], [0, 0, 1, 1], [], []>} : vector<8x128xbf16>, vector<128x128xbf16>, vector<8x128xf32> -> vector<8x128xf32>
    %28 = vector.broadcast %26 : vector<1x128xf32> to vector<8x128xf32>
    %29 = arith.addf %27, %28 : vector<8x128xf32>
    %cst_23 = arith.constant 0.000000e+00 : f32
    %30 = vector.broadcast %cst_23 : f32 to vector<8x128xf32>
    %31 = arith.subf %30, %29 : vector<8x128xf32>
    %32 = math.exp %31 : vector<8x128xf32>
    %cst_24 = arith.constant 1.000000e+00 : f32
    %33 = vector.broadcast %cst_24 : f32 to vector<8x128xf32>
    %34 = arith.addf %33, %32 : vector<8x128xf32>
    %35 = tpu.reciprocal %34 : vector<8x128xf32> -> vector<8x128xf32>
    %c0_25 = arith.constant 0 : index
    %c0_26 = arith.constant 0 : index
    %36 = vector.load %arg10[%c0_25, %c0_26] : memref<8x128xf32, #tpu.memory_space<vmem>>, vector<8x128xf32>
    tpu.vector_store %arg10[%c0_25, %c0_26], %35 {strides = array<i32>} : memref<8x128xf32, #tpu.memory_space<vmem>>, vector<8x128xf32>,
    return
  }
  func.func @transform_0(%arg0: i32) -> (i32, i32) {
    %c0_i32 = arith.constant 0 : i32
    %c0_i32_0 = arith.constant 0 : i32
    return %arg0, %c0_i32 : i32, i32
  }
  func.func @transform_1(%arg0: i32) -> (i32, i32) {
    %c0_i32 = arith.constant 0 : i32
    %c0_i32_0 = arith.constant 0 : i32
    %c0_i32_1 = arith.constant 0 : i32
    return %c0_i32, %c0_i32_0 : i32, i32
  }
  func.func @transform_2(%arg0: i32) -> (i32, i32) {
    %c0_i32 = arith.constant 0 : i32
    %c0_i32_0 = arith.constant 0 : i32
    %c0_i32_1 = arith.constant 0 : i32
    return %c0_i32, %c0_i32_0 : i32, i32
  }
  func.func @transform_3(%arg0: i32) -> (i32, i32) {
    %c0_i32 = arith.constant 0 : i32
    %c0_i32_0 = arith.constant 0 : i32
    %c0_i32_1 = arith.constant 0 : i32
    return %c0_i32, %c0_i32_0 : i32, i32
  }
  func.func @transform_4(%arg0: i32) -> (i32, i32) {
    %c0_i32 = arith.constant 0 : i32
    %c0_i32_0 = arith.constant 0 : i32
    %c0_i32_1 = arith.constant 0 : i32
    return %c0_i32, %c0_i32_0 : i32, i32
  }
  func.func @transform_5(%arg0: i32) -> (i32, i32) {
    %c0_i32 = arith.constant 0 : i32
    %c0_i32_0 = arith.constant 0 : i32
    %c0_i32_1 = arith.constant 0 : i32
    return %c0_i32, %c0_i32_0 : i32, i32
  }
  func.func @transform_6(%arg0: i32) -> (i32, i32) {
    %c0_i32 = arith.constant 0 : i32
    %c0_i32_0 = arith.constant 0 : i32
    %c0_i32_1 = arith.constant 0 : i32
    return %c0_i32, %c0_i32_0 : i32, i32
  }
  func.func @transform_7(%arg0: i32) -> (i32, i32) {
    %c0_i32 = arith.constant 0 : i32
    %c0_i32_0 = arith.constant 0 : i32
    %c0_i32_1 = arith.constant 0 : i32
    return %c0_i32, %c0_i32_0 : i32, i32
  }
  func.func @transform_8(%arg0: i32) -> (i32, i32) {
    %c0_i32 = arith.constant 0 : i32
    %c0_i32_0 = arith.constant 0 : i32
    %c0_i32_1 = arith.constant 0 : i32
    return %c0_i32, %c0_i32_0 : i32, i32
  }
  func.func @transform_9(%arg0: i32) -> (i32, i32) {
    %c0_i32 = arith.constant 0 : i32
    %c0_i32_0 = arith.constant 0 : i32
    return %arg0, %c0_i32 : i32, i32
  }
}

</mosaic_0001>

<bundles_post_ra>
// kernel: tpu_custom_call.1
= control target key start
LH: loop header
LB: loop body
LE: loop exit
PB: predicated region body
PF: predicated region fallthrough
CT: control target
= control target key end

     0   :  { %14 = vsyncpa [#allocation3], 0  ;;  %s894_s0 = inlined_call_operand.hbm [shape: bf16[8,128], index: 0, kind: input, shape index: {}]   ;;  %s895_s1 = inlined_call_operand.hbm [shape: bf16[128,128], index: 1, kind: input, shape index: {}]   ;;  %s896_s2 = inlined_call_operand.vmem [shape: f32[1,128], index: 2, kind: input, shape index: {}]   ;;  %s897_s3 = inlined_call_operand.hbm [shape: bf16[128,128], index: 3, kind: input, shape index: {}]   ;;  %s898_s4 = inlined_call_operand.vmem [shape: f32[1,128], index: 4, kind: input, shape index: {}]   ;;  %s899_s5 = inlined_call_operand.hbm [shape: bf16[128,128], index: 5, kind: input, shape index: {}]   ;;  %s900_s6 = inlined_call_operand.vmem [shape: f32[1,128], index: 6, kind: input, shape index: {}]   ;;  %s901_s7 = inlined_call_operand.hbm [shape: bf16[128,128], index: 7, kind: input, shape index: {}]   ;;  %s902_s8 = inlined_call_operand.vmem [shape: f32[1,128], index: 8, kind: input, shape index: {}]   ;;  %s903_s9 = inlined_call_operand.hbm [shape: f32[8,128], index: 9, kind: output, shape index: {}]  }
   0x1   :  { %15 = vsyncpa [#allocation6], 0 }
   0x2   :  { %16 = vsyncpa [#allocation9], 0  ;;  %s33_s11 = sshll.u32 %s895_s1, 4  ;;  %s34_s11 = int_to_ptr.hbm [resolvable:$true] %s33_s11 }
   0x3   :  { %17 = vsyncpa [#allocation4], 0  ;;  %s806_s12 = smov [#allocation5]   ;;  %s63_s16 = sshll.u32 %s899_s5, 4  ;;  %s64_s16 = int_to_ptr.hbm [resolvable:$true] %s63_s16 }
   0x4   :  { %s35_s13 = sshll.u32 %s806_s12, 4  ;;  %s807_s17 = smov 64   ;;  %s36_s13 = int_to_ptr.vmem [resolvable:$true] %s35_s13 }
   0x5   :  { %s808_s18 = smov 4   ;;  %s809_s19 = smov [#allocation8]  }
   0x6   :  { %41 = dma.hbm_to_vmem [thread:$0]  %s34_s11, 1024, %s36_s13, [#allocation6], %s807_s17, %s807_s17, %s808_s18  }
   0x7   :  { %s65_s20 = sshll.u32 %s809_s19, 4  ;;  %s23_s23 = sshll.u32 %s894_s0, 4  ;;  %s66_s20 = int_to_ptr.vmem [resolvable:$true] %s65_s20  ;;  %s24_s23 = int_to_ptr.hbm [resolvable:$true] %s23_s23 }
   0x8   :  { %71 = dma.hbm_to_vmem [thread:$0]  %s64_s16, 1024, %s66_s20, [#allocation9], %s807_s17, %s807_s17, %s808_s18  }
   0x9   :  { %s48_s25 = sshll.u32 %s897_s3, 4  ;;  %s810_s26 = smov [#allocation2]   ;;  %s49_s25 = int_to_ptr.hbm [resolvable:$true] %s48_s25 }
   0xa   :  { %s25_s27 = sshll.u32 %s810_s26, 4  ;;  %s811_s5 = smov [#allocation7]   ;;  %s26_s27 = int_to_ptr.vmem [resolvable:$true] %s25_s27 }
   0xb   :  { %28 = dma.hbm_to_vmem [thread:$0]  %s24_s23, 64, %s26_s27, [#allocation3]  }
   0xc   :  { %s50_s28 = sshll.u32 %s811_s5, 4  ;;  %s78_s10 = sshll.u32 %s901_s7, 4  ;;  %s51_s28 = int_to_ptr.vmem [resolvable:$true] %s50_s28  ;;  %s79_s10 = int_to_ptr.hbm [resolvable:$true] %s78_s10 }
   0xd   :  { %56 = dma.hbm_to_vmem [thread:$0]  %s49_s25, 1024, %s51_s28, [#allocation6], %s807_s17, %s807_s17, %s808_s18  }
   0xe   :  { %s812_s0 = smov [#allocation10]  }
   0xf   :  { %s80_s11 = sshll.u32 %s812_s0, 4  ;;  %s81_s11 = int_to_ptr.vmem [resolvable:$true] %s80_s11 }
  0x10   :  { %86 = dma.hbm_to_vmem [thread:$0]  %s79_s10, 1024, %s81_s11, [#allocation9], %s807_s17, %s807_s17, %s808_s18  }
  0x11   :  { %798 = dma.done.wait [#allocation3], 64  }
  0x12   :  { %799 = vsyncadd [#allocation3], 4294967232 }
  0x13   :  { %800 = dma.done.wait [#allocation6], 2048  }
  0x14   :  { %801 = vsyncadd [#allocation6], 4294965248 }
  0x15   :  { %802 = dma.done.wait [#allocation9], 2048  }
  0x16   :  { %803 = vsyncadd [#allocation9], 4294965248  ;;  %v613_v0 = vld [vmem:[#allocation5 + $0x38] sm:$0xff]  ;;  %v612_v1 = vld [vmem:[#allocation5 + $0x30] sm:$0xff]  ;;  %s466_s18 = sshll.u32 %s903_s9, 4  ;;  %s467_s18 = int_to_ptr.hbm [resolvable:$true] %s466_s18 }
  0x17   :  { %178 = vmatpush.bf16.msra.mxu0 %v613_v0  ;;  %v621_v2 = vld [vmem:[#allocation7 + $0x38] sm:$0xff]  ;;  %v620_v3 = vld [vmem:[#allocation7 + $0x30] sm:$0xff]  ;;  %v611_v4 = vld [vmem:[#allocation5 + $0x28] sm:$0xff] }
  0x18   :  { %261 = vmatpush.bf16.msra.mxu1 %v621_v2  ;;  %v619_v5 = vld [vmem:[#allocation7 + $0x28] sm:$0xff]  ;;  %v610_v6 = vld [vmem:[#allocation5 + $0x20] sm:$0xff]  ;;  %v609_v8 = vld [vmem:[#allocation5 + $0x18] sm:$0xff] }
  0x19   :  { %v618_v7 = vld [vmem:[#allocation7 + $0x20] sm:$0xff]  ;;  %v617_v9 = vld [vmem:[#allocation7 + $0x18] sm:$0xff]  ;;  %v608_v10 = vld [vmem:[#allocation5 + $0x10] sm:$0xff] }
  0x1a   :  { %v616_v11 = vld [vmem:[#allocation7 + $0x10] sm:$0xff]  ;;  %v607_v12 = vld [vmem:[#allocation5 + $0x8] sm:$0xff]  ;;  %v606_v13 = vld [vmem:[#allocation5] sm:$0xff] }
  0x1b   :  { %179 = vmatpush.bf16.msra.mxu0 %v612_v1  ;;  %v109_v14 = vld [vmem:[#allocation2] sm:$0xf]  ;;  %v615_v15 = vld [vmem:[#allocation7 + $0x8] sm:$0xff]  ;;  %v614_v16 = vld [vmem:[#allocation7] sm:$0xff] }
  0x1c   :  { %262 = vmatpush.bf16.msra.mxu1 %v620_v3  ;;  %v629_v17 = vld [vmem:[#allocation8 + $0x38] sm:$0xff]  ;;  %v628_v18 = vld [vmem:[#allocation8 + $0x30] sm:$0xff]  ;;  %v627_v19 = vld [vmem:[#allocation8 + $0x28] sm:$0xff] }
  0x1d   :  { %344 = vmatpush.bf16.msra.mxu2 %v629_v17  ;;  %v626_v20 = vld [vmem:[#allocation8 + $0x20] sm:$0xff]  ;;  %v625_v21 = vld [vmem:[#allocation8 + $0x18] sm:$0xff]  ;;  %v624_v22 = vld [vmem:[#allocation8 + $0x10] sm:$0xff] }
  0x1e   :  { %v646_v23 = vld [vmem:[%s896_s2] ss:$0 sm:$0xff]  ;;  %v623_v29 = vld [vmem:[#allocation8 + $0x8] sm:$0xff]  ;;  %v622_v30 = vld [vmem:[#allocation8] sm:$0xff] }
  0x1f   :  { %180 = vmatpush.bf16.msra.mxu0 %v611_v4  ;;  %v637_v31 = vld [vmem:[#allocation10 + $0x38] sm:$0xff]  ;;  %v636_v32 = vld [vmem:[#allocation10 + $0x30] sm:$0xff]  ;;  %v635_v33 = vld [vmem:[#allocation10 + $0x28] sm:$0xff] }
  0x20   :  { %263 = vmatpush.bf16.msra.mxu1 %v619_v5  ;;  %427 = vmatpush.bf16.msra.mxu3 %v637_v31  ;;  %v634_v34 = vld [vmem:[#allocation10 + $0x20] sm:$0xff]  ;;  %v633_v35 = vld [vmem:[#allocation10 + $0x18] sm:$0xff]  ;;  %v632_v36 = vld [vmem:[#allocation10 + $0x10] sm:$0xff] }
  0x21   :  { %345 = vmatpush.bf16.msra.mxu2 %v628_v18  ;;  %v647_v37 = vld [vmem:[%s898_s4] ss:$0 sm:$0xff]  ;;  %v631_v43 = vld [vmem:[#allocation10 + $0x8] sm:$0xff]  ;;  %v630_v44 = vld [vmem:[#allocation10] sm:$0xff] }
  0x22   :  { %v648_v45 = vld [vmem:[%s900_s6] ss:$0 sm:$0xff]  ;;  %s813_s6 = smov [#allocation11]  }
  0x23   :  { %181 = vmatpush.bf16.msra.mxu0 %v610_v6  ;;  %v649_v51 = vld [vmem:[%s902_s8] ss:$0 sm:$0xff]  ;;  %s464_s16 = sshll.u32 %s813_s6, 4  ;;  %s465_s16 = int_to_ptr.vmem [resolvable:$true] %s464_s16 }
  0x24   :  { %264 = vmatpush.bf16.msra.mxu1 %v618_v7  ;;  %428 = vmatpush.bf16.msra.mxu3 %v636_v32 }
  0x25   :  { %346 = vmatpush.bf16.msra.mxu2 %v627_v19 }
  0x27   :  { %182 = vmatpush.bf16.msra.mxu0 %v609_v8 }
  0x28   :  { %265 = vmatpush.bf16.msra.mxu1 %v617_v9  ;;  %429 = vmatpush.bf16.msra.mxu3 %v635_v33 }
  0x29   :  { %347 = vmatpush.bf16.msra.mxu2 %v626_v20 }
  0x2b   :  { %183 = vmatpush.bf16.msra.mxu0 %v608_v10 }
  0x2c   :  { %266 = vmatpush.bf16.msra.mxu1 %v616_v11  ;;  %430 = vmatpush.bf16.msra.mxu3 %v634_v34 }
  0x2d   :  { %348 = vmatpush.bf16.msra.mxu2 %v625_v21 }
  0x2f   :  { %184 = vmatpush.bf16.msra.mxu0 %v607_v12 }
  0x30   :  { %267 = vmatpush.bf16.msra.mxu1 %v615_v15  ;;  %431 = vmatpush.bf16.msra.mxu3 %v633_v35 }
  0x31   :  { %349 = vmatpush.bf16.msra.mxu2 %v624_v22 }
  0x33   :  { %185 = vmatpush.bf16.msra.mxu0 %v606_v13 }
  0x34   :  { %268 = vmatpush.bf16.msra.mxu1 %v614_v16  ;;  %432 = vmatpush.bf16.msra.mxu3 %v632_v36 }
  0x35   :  { %350 = vmatpush.bf16.msra.mxu2 %v623_v29 }
  0x36   :  { %186 = vmatmul.bf16.vlgmr.msra.gmra.mxu0 %v109_v14 }
  0x38   :  { %433 = vmatpush.bf16.msra.mxu3 %v631_v43 }
  0x39   :  { %351 = vmatpush.bf16.msra.mxu2 %v622_v30 }
  0x3c   :  { %434 = vmatpush.bf16.msra.mxu3 %v630_v44 }
  0xb3   :  { %v187_v24 = vpop.f32.mrf.mxu0 }
  0xb4   :  { %v188_v25 = vadd.f32 %v646_v23, %v187_v24 }
  0xb6   :  { %v191_v26 = vmax.f32 %v188_v25, 0.0 }
  0xb8   :  { %v192_v27 = vpack.c.bf16 %v191_v26, %v191_v26 }
  0xba   :  { %269 = vmatmul.bf16.vlgmr.msra.gmra.mxu1 %v192_v27 }
  0xbb   :  { %v189_v28 = vpop.f32.mrf.mxu0 }
 0x137   :  { %v270_v38 = vpop.f32.mrf.mxu1 }
 0x138   :  { %v271_v39 = vadd.f32 %v647_v37, %v270_v38 }
 0x13a   :  { %v274_v40 = vmax.f32 %v271_v39, 0.0 }
 0x13c   :  { %v275_v41 = vpack.c.bf16 %v274_v40, %v274_v40 }
 0x13e   :  { %352 = vmatmul.bf16.vlgmr.msra.gmra.mxu2 %v275_v41 }
 0x13f   :  { %v272_v42 = vpop.f32.mrf.mxu1 }
 0x1c1   :  { %v353_v46 = vpop.f32.mrf.mxu2 }
 0x1c2   :  { %v354_v47 = vadd.f32 %v648_v45, %v353_v46 }
 0x1c4   :  { %v357_v48 = vmax.f32 %v354_v47, 0.0 }
 0x1c6   :  { %v358_v49 = vpack.c.bf16 %v357_v48, %v357_v48 }
 0x1c8   :  { %435 = vmatmul.bf16.vlgmr.msra.gmra.mxu3 %v358_v49 }
 0x1c9   :  { %v355_v50 = vpop.f32.mrf.mxu2 }
 0x24b   :  { %v436_v52 = vpop.f32.mrf.mxu3 }
 0x24c   :  { %v437_v53 = vadd.f32 %v649_v51, %v436_v52 }
 0x24e   :  { %v440_v54 = vsub.f32 0.0, %v437_v53 }
 0x250   :  { %v441_v55 = vmul.f32 1.442695, %v440_v54 }
 0x252   :  { %650 = vpow2.f32 %v441_v55 }
 0x253   :  { %v438_v56 = vpop.f32.mrf.mxu3 }
 0x258   :  { %v651_v57 = vpop.eup %650 }
 0x259   :  { %v443_v58 = vadd.f32 1.0, %v651_v57 }
 0x25b   :  { %652 = vrcp.f32 %v443_v58  ;;  %v455_v62 = vand.u32 2147483648, %v443_v58  ;;  %v453_v0 = vand.u32 2147483647, %v443_v58  ;;  %vm449_vm1 = vweird.f32 %v443_v58 }
 0x25d   :  { %v456_v2 = vor.u32 1.1754944e-38, %v455_v62  ;;  %vm454_vm3 = vcmp.eq.f32.partialorder %v453_v0, 8.507059e+37 }
 0x261   :  { %v653_v59 = vpop.eup %652 }
 0x262   :  { %v445_v60 = vmul.f32 %v653_v59, %v443_v58  ;;  %vm450_vm0 = vweird.f32 %v653_v59 }
 0x263   :  { %vm451_vm2 = vmor %vm449_vm1, %vm450_vm0 }
 0x264   :  { %v446_v61 = vsub.f32 1.0, %v445_v60 }
 0x266   :  { %v447_v63 = vmul.f32 %v653_v59, %v446_v61 }
 0x268   :  { %v448_v1 = vadd.f32 %v653_v59, %v447_v63 }
 0x26a   :  { %v452_v3 = vsel %vm451_vm2, %v653_v59, %v448_v1 }
 0x26b   :  { %v457_v4 = vsel %vm454_vm3, %v456_v2, %v452_v3 }
 0x26c   :  { %458 = vst [vmem:[#allocation11] sm:$0xff] %v457_v4 }
 0x26d   :  { %469 = dma.vmem_to_hbm [thread:$0]  %s465_s16, 128, %s467_s18, [#allocation4]  }
 0x26e   :  { %804 = dma.done.wait [#allocation4], 128  }
 0x26f   :  { %805 = vsyncadd [#allocation4], 4294967168 }
 0x270   :  { %474 = vsyncpa [#allocation3], 1 }
 0x271   :  { %475 = vsyncpa [#allocation6], 1 }
 0x272   :  { %476 = vsyncpa [#allocation9], 1 }
 0x273   :  { %477 = vsyncpa [#allocation4], 1 }

</bundles_post_ra>
